<compile_context>
chip_gen: v7x
topology: tpu7x:2x2x1
jax: 0.10.0
libtpu: 0.0.40
codegen_flags: <defaults>
</compile_context>

<pallas_src>
import functools

import jax
import jax.numpy as jnp
from jax.experimental import pallas as pl
from jax.experimental.pallas import tpu as pltpu


def _fixed_affine_kernel(params_ref, x_ref, o_ref, *, compute_dtype):
    # params_ref lives in SMEM: [factor, offset] as f32 scalars.
    f = params_ref[0].astype(compute_dtype)
    b = params_ref[1].astype(compute_dtype)
    o_ref[...] = (x_ref[...].astype(compute_dtype) * f + b).astype(o_ref.dtype)


def fixed_affine(x, factor, offset, *, target_tile_bytes=4 << 20,
                 min_pallas_bytes=1 << 20):
    """y = x * factor + offset via a lane-dense, HBM-roofline Pallas kernel."""
    orig_shape = x.shape
    dtype = x.dtype
    total = x.size
    itemsize = jnp.dtype(dtype).itemsize

    # Compute dtype: bf16 stays bf16 (mem-bound either way), other dtypes f32.
    if dtype == jnp.bfloat16:
        compute_dtype = jnp.bfloat16
    else:
        # TODO(synk): integer inputs keep integer output here, whereas torch
        # promotes int * float-scalar to a float tensor.
        compute_dtype = jnp.float32

    # --- Small-input fallback: a fused XLA op beats any kernel launch. ------
    if total == 0 or total * itemsize < min_pallas_bytes:
        return (x.astype(compute_dtype) * factor + offset).astype(dtype)

    # --- Lane-dense view: (rows, C), C = largest of {1024..128} dividing. ---
    C = None
    for cand in (1024, 512, 256, 128):
        if total % cand == 0:
            C = cand
            break
    flat = x.reshape(-1)
    pad_tail = 0
    if C is None:                        # total % 128 != 0: minimal 1D tail pad
        C = 128
        pad_tail = (-total) % C
        flat = jnp.pad(flat, (0, pad_tail))
    rows = flat.shape[0] // C
    x2 = flat.reshape(rows, C)

    # --- Row tiling: multi-MiB tiles, sublane-aligned, >=2 steps if large. ---
    row_bytes = C * itemsize
    row_tile = max(1, min(rows, target_tile_bytes // row_bytes))
    if rows * row_bytes > 2 * target_tile_bytes:
        # v7x has 2 TensorCores; keep >= 2 grid steps on the "parallel" axis.
        row_tile = min(row_tile, pl.cdiv(rows, 2))
    if row_tile < rows:
        sub = max(8, 32 // itemsize)     # 8 f32 / 16 bf16 / 32 int8
        row_tile = min(rows, max(sub, (row_tile // sub) * sub))
    num_tiles = pl.cdiv(rows, row_tile)  # ragged last block is masked by Pallas

    tile_bytes = row_tile * C * itemsize
    # Double-buffered (in + out) tiles plus headroom; safe on v7x 64 MiB VMEM.
    vmem_limit = min(48 << 20, max(16 << 20, 4 * tile_bytes + (8 << 20)))

    params = jnp.asarray([factor, offset], dtype=jnp.float32)
    kernel = functools.partial(_fixed_affine_kernel, compute_dtype=compute_dtype)

    out2 = pl.pallas_call(
        kernel,
        out_shape=jax.ShapeDtypeStruct((rows, C), dtype),
        grid_spec=pltpu.PrefetchScalarGridSpec(
            num_scalar_prefetch=0,
            grid=(num_tiles,),
            in_specs=[
                pl.BlockSpec(memory_space=pltpu.MemorySpace.SMEM),   # params
                pl.BlockSpec((row_tile, C), lambda i: (i, 0)),       # x tile
            ],
            out_specs=pl.BlockSpec((row_tile, C), lambda i: (i, 0)),
        ),
        compiler_params=pltpu.CompilerParams(
            dimension_semantics=("parallel",),
            vmem_limit_bytes=int(vmem_limit),
        ),
        cost_estimate=pl.CostEstimate(
            flops=2 * total,
            transcendentals=0,
            bytes_accessed=2 * total * itemsize,
        ),
    )(params, x2)

    if pad_tail:
        return out2.reshape(-1)[:total].reshape(orig_shape)
    return out2.reshape(orig_shape)


if __name__ == "__main__":
    key = jax.random.PRNGKey(0)
    k0, k1, k2 = jax.random.split(key, 3)

    factor, offset = 2.5, -0.75

    # NCHW input consistent with the module's typical conv-feature use.
    x = jax.random.normal(k0, (2, 4, 16, 16), dtype=jnp.float32)

    # 1) Default wrapper path: small input takes the plain-JAX fallback.
    y_small = jax.block_until_ready(fixed_affine(x, factor, offset))
    assert y_small.shape == x.shape and y_small.dtype == x.dtype
    assert jnp.allclose(y_small, x * factor + offset, atol=1e-6, rtol=1e-6)

    # 2) Force the Pallas path on the same small shape (exercises the kernel).
    y_pallas = jax.block_until_ready(
        fixed_affine(x, factor, offset, min_pallas_bytes=0))
    assert y_pallas.shape == x.shape and y_pallas.dtype == x.dtype
    assert jnp.allclose(y_pallas, x * factor + offset, atol=1e-6, rtol=1e-6)

    # 3) Awkward total (not a multiple of 128): tail-pad + slice path.
    x_odd = jax.random.normal(k1, (2, 3, 5, 7), dtype=jnp.float32)
    y_odd = jax.block_until_ready(
        fixed_affine(x_odd, factor, offset, min_pallas_bytes=0))
    assert jnp.allclose(y_odd, x_odd * factor + offset, atol=1e-6, rtol=1e-6)

    # 4) Ragged last grid block (rows not a multiple of row_tile) via a tiny
    #    tile target: exercises Pallas' masked partial-block writeback.
    x_rag = jax.random.normal(k2, (2, 4, 40, 32), dtype=jnp.float32)
    y_rag = jax.block_until_ready(
        fixed_affine(x_rag, factor, offset,
                     min_pallas_bytes=0, target_tile_bytes=1 << 15))
    assert jnp.allclose(y_rag, x_rag * factor + offset, atol=1e-6, rtol=1e-6)

    print("KERNEL_OK")
</pallas_src>

<mosaic_0001>
module attributes {stable_mosaic.version = 11 : i64} {
  func.func @_fixed_affine_kernel(%arg0: i32, %arg1: memref<2xf32, #tpu.memory_space<smem>>, %arg2: memref<2x1024xf32, #tpu.memory_space<vmem>>, %arg3: memref<2x1024xf32, #tpu.memory_space<vmem>>) attributes {dimension_semantics = [#tpu.dimension_semantics<parallel>], iteration_bounds = array<i64: 1>, scalar_prefetch = 0 : i64, scratch_operands = 0 : i64, tpu.core_type = #tpu.core_type<tc>, window_params = [{transform_indices = @transform_0, window_bounds = array<i64: 2>}, {transform_indices = @transform_1, window_bounds = array<i64: 2, 1024>}, {transform_indices = @transform_2, window_bounds = array<i64: 2, 1024>}]} {
    %c0 = arith.constant 0 : index
    %0 = memref.load %arg1[%c0] : memref<2xf32, #tpu.memory_space<smem>>
    %c1 = arith.constant 1 : index
    %1 = memref.load %arg1[%c1] : memref<2xf32, #tpu.memory_space<smem>>
    %c0_0 = arith.constant 0 : index
    %c0_1 = arith.constant 0 : index
    %2 = vector.load %arg2[%c0_0, %c0_1] : memref<2x1024xf32, #tpu.memory_space<vmem>>, vector<2x1024xf32>
    %3 = vector.broadcast %0 : f32 to vector<2x1024xf32>
    %4 = arith.mulf %2, %3 : vector<2x1024xf32>
    %5 = vector.broadcast %1 : f32 to vector<2x1024xf32>
    %6 = arith.addf %4, %5 : vector<2x1024xf32>
    %c0_2 = arith.constant 0 : index
    %c0_3 = arith.constant 0 : index
    %7 = vector.load %arg3[%c0_2, %c0_3] : memref<2x1024xf32, #tpu.memory_space<vmem>>, vector<2x1024xf32>
    tpu.vector_store %arg3[%c0_2, %c0_3], %6 {strides = array<i32>} : memref<2x1024xf32, #tpu.memory_space<vmem>>, vector<2x1024xf32>,
    return
  }
  func.func @transform_0(%arg0: i32) -> i32 {
    %c0_i32 = arith.constant 0 : i32
    %c0_i32_0 = arith.constant 0 : i32
    return %c0_i32 : i32
  }
  func.func @transform_1(%arg0: i32) -> (i32, i32) {
    %c0_i32 = arith.constant 0 : i32
    %c0_i32_0 = arith.constant 0 : i32
    return %arg0, %c0_i32 : i32, i32
  }
  func.func @transform_2(%arg0: i32) -> (i32, i32) {
    %c0_i32 = arith.constant 0 : i32
    %c0_i32_0 = arith.constant 0 : i32
    return %arg0, %c0_i32 : i32, i32
  }
}

</mosaic_0001>

<bundles_post_ra>
// kernel: tpu_custom_call.1
= control target key start
LH: loop header
LB: loop body
LE: loop exit
PB: predicated region body
PF: predicated region fallthrough
CT: control target
= control target key end

     0   :  { %7 = vsyncpa [#allocation5], 0  ;;  %s181_s0 = inlined_call_operand.hbm [shape: f32[2], index: 0, kind: input, shape index: {}]   ;;  %s182_s1 = inlined_call_operand.hbm [shape: f32[2,1024], index: 1, kind: input, shape index: {}]   ;;  %s183_s2 = inlined_call_operand.hbm [shape: f32[2,1024], index: 2, kind: output, shape index: {}]  }
   0x1   :  { %8 = vsyncpa [#allocation3], 0 }
   0x2   :  { %9 = vsyncpa [#allocation4], 0  ;;  %s67_s11 = scalar_lea.hbm %s181_s0, 16 }
   0x3   :  { %p68_p0 = scmp.ne.s32.totalorder %s181_s0, %s67_s11  ;;  %p71_p1 = scmp.lt.u32.totalorder %s67_s11, %s181_s0 }
   0x5   :  { %p73_p2 = pnand %p71_p1, %p68_p0 }
   0x7   :  { %76 = shalt.err (!%p73_p2)
}
   0x8   :  { %s127_s16 = smov [#allocation2]   ;;  %s128_s19 = smov [#allocation6]  }
   0x9   :  { %17 = dma.hbm_to_smem %s181_s0, 16, %s127_s16, [#allocation5]  }
   0xa   :  { %s24_s20 = sshll.u32 %s128_s19, 4  ;;  %s77_s23 = scalar_lea.hbm %s182_s1, 256  ;;  %s25_s20 = int_to_ptr.vmem [resolvable:$true] %s24_s20 }
   0xb   :  { %p78_p3 = scmp.ne.s32.totalorder %s182_s1, %s77_s23  ;;  %p81_p4 = scmp.lt.u32.totalorder %s77_s23, %s182_s1 }
   0xd   :  { %p83_p5 = pnand %p81_p4, %p78_p3 }
   0xf   :  { %86 = shalt.err (!%p83_p5)
}
  0x10   :  { %s87_s28 = scalar_lea.vmem %s25_s20, 256  ;;  %p92_p7 = scmp.lt.s32.totalorder %s25_s20, %s25_s20 }
  0x11   :  { %p88_p6 = scmp.ne.s32.totalorder %s25_s20, %s87_s28  ;;  %p93_p8 = scmp.lt.s32.totalorder %s87_s28, %s87_s28 }
  0x13   :  { %p94_p9 = por %p93_p8, %p92_p7 }
  0x15   :  { %p95_p10 = pnand %p94_p9, %p88_p6 }
  0x17   :  { %98 = shalt.err (!%p95_p10)
}
  0x18   :  { %27 = dma.hbm_to_vmem [thread:$0]  %s182_s1, 256, %s25_s20, [#allocation3]  }
  0x19   :  { %121 = dma.done.wait [#allocation5], 16  }
  0x1a   :  { %122 = vsyncadd [#allocation5], 4294967280 }
  0x1b   :  { %123 = dma.done.wait [#allocation3], 256  }
  0x1c   :  { %124 = vsyncadd [#allocation3], 4294967040 }
  0x1d   :  { %34 = sfence }
  0x1e   :  { %s35_s30 = sld [smem:[#allocation2]]  ;;  %s63_s3 = sld [smem:[#allocation2 + $0x1]]  ;;  %v37_v0 = vld [vmem:[#allocation6] sm:$0xff]  ;;  %v38_v1 = vld [vmem:[#allocation6 + $0x8] sm:$0xff] }
  0x1f   :  { %s129_s4 = smov [#allocation7]  }
  0x20   :  { %s53_s5 = sshll.u32 %s129_s4, 4  ;;  %s54_s5 = int_to_ptr.vmem [resolvable:$true] %s53_s5 }
  0x21   :  { %s99_s1 = scalar_lea.vmem %s54_s5, 256  ;;  %p104_p12 = scmp.lt.s32.totalorder %s54_s5, %s54_s5 }
  0x22   :  { %p100_p11 = scmp.ne.s32.totalorder %s54_s5, %s99_s1  ;;  %p105_p13 = scmp.lt.s32.totalorder %s99_s1, %s99_s1 }
  0x24   :  { %v39_v2 = vstv %s35_s30  ;;  %v42_v3 = vstv %s63_s3  ;;  %p106_p0 = por %p105_p13, %p104_p12 }
  0x25   :  { %v40_v4 = vmul.f32 %v39_v2, %v37_v0  ;;  %v41_v5 = vmul.f32 %v39_v2, %v38_v1 }
  0x26   :  { %p107_p1 = pnand %p106_p0, %p100_p11 }
  0x27   :  { %v43_v6 = vadd.f32 %v42_v3, %v40_v4  ;;  %v44_v7 = vadd.f32 %v42_v3, %v41_v5 }
  0x29   :  { %45 = vst [vmem:[#allocation7] sm:$0xff] %v43_v6  ;;  %46 = vst [vmem:[#allocation7 + $0x8] sm:$0xff] %v44_v7 }
  0x2a   :  { %110 = shalt.err (!%p107_p1)
}
  0x2b   :  { %s111_s8 = scalar_lea.hbm %s183_s2, 256 }
  0x2c   :  { %p112_p2 = scmp.ne.s32.totalorder %s183_s2, %s111_s8  ;;  %p115_p3 = scmp.lt.u32.totalorder %s111_s8, %s183_s2 }
  0x2e   :  { %p117_p4 = pnand %p115_p3, %p112_p2 }
  0x30   :  { %120 = shalt.err (!%p117_p4)
}
  0x31   :  { %56 = dma.vmem_to_hbm [thread:$0]  %s54_s5, 256, %s183_s2, [#allocation4]  }
  0x32   :  { %125 = dma.done.wait [#allocation4], 256  }
  0x33   :  { %126 = vsyncadd [#allocation4], 4294967040 }
  0x34   :  { %60 = vsyncpa [#allocation3], 1 }
  0x35   :  { %61 = vsyncpa [#allocation4], 1 }
  0x36   :  { %62 = vsyncpa [#allocation5], 1 }

</bundles_post_ra>
